<compile_context>
chip_gen: v7x
topology: tpu7x:2x2x1
jax: 0.10.0
libtpu: 0.0.40
codegen_flags: <defaults>
</compile_context>

<pallas_src>
import jax
import jax.numpy as jnp
from jax.experimental import pallas as pl
from jax.experimental.pallas import tpu as pltpu


def _mlp_kernel(x_ref, w1_ref, b1_ref, w2_ref, b2_ref, o_ref):
    # First linear (MXU, f32 accumulation) + bias + ReLU.
    h = jnp.dot(x_ref[...], w1_ref[...], preferred_element_type=jnp.float32)
    h = jnp.maximum(h + b1_ref[...], 0.0)            # b1 is (1, H) -> broadcasts over rows
    # Dropout(p=0.2) is identity in eval/inference mode.
    # TODO(synk): training-mode dropout (stochastic mask via pltpu.prng_*) not implemented.
    h = h.astype(w2_ref.dtype)                       # bf16 second matmul when compute dtype is bf16
    out = jnp.dot(h, w2_ref[...], preferred_element_type=jnp.float32)
    o_ref[...] = (out + b2_ref[...]).astype(o_ref.dtype)   # narrow (tile_b, C) store


def _round_up(x, m):
    return ((x + m - 1) // m) * m


def _pick_tile_b(B, max_tile=2048):
    """Batch tile: large (<= 2048 rows) to amortize ~0.35us/step overhead, with an even number
    of grid steps (>= 2) so a 'parallel' grid can use both v7x TensorCores."""
    if B <= 8:
        return 8
    steps = max(2, -(-B // max_tile))
    steps += steps % 2                  # even step count (v7x megacore)
    return _round_up(-(-B // steps), 8)


def feature_classifier_forward(x, w1, b1, w2, b2, *, tile_b=None, compute_dtype=jnp.bfloat16):
    """x: [B, D_in]; w1: [D_in, H]; b1: [1, H]; w2: [H, C]; b2: [1, C] -> [B, C].

    Weights are the pre-transposed ([in, out]) PyTorch nn.Linear weights.
    compute_dtype: storage dtype for x/W1/W2 inside the kernel (default bf16); accumulation is
    always f32. Pass None to keep the caller's dtypes (exact f32 path).
    """
    B, D_in = x.shape
    H = w1.shape[1]
    C = w2.shape[1]
    out_dtype = x.dtype

    if compute_dtype is not None:
        x = x.astype(compute_dtype)
        w1 = w1.astype(compute_dtype)
        w2 = w2.astype(compute_dtype)
    # Biases are added to f32 accumulators; keep them in f32.
    b1 = b1.astype(jnp.float32)
    b2 = b2.astype(jnp.float32)

    if tile_b is None:
        tile_b = _pick_tile_b(B)
    tile_b = _round_up(min(tile_b, max(B, 8)), 8)

    grid_b = -(-B // tile_b)            # ceil-div grid
    B_pad = grid_b * tile_b
    if B_pad != B:
        x = jnp.pad(x, ((0, B_pad - B), (0, 0)))   # padded rows computed then sliced off

    x_isz = jnp.dtype(x.dtype).itemsize
    w_isz = jnp.dtype(w1.dtype).itemsize
    o_isz = jnp.dtype(out_dtype).itemsize

    flops = 2 * B_pad * (D_in * H + H * C)
    bytes_accessed = (
        B_pad * D_in * x_isz
        + B_pad * C * o_isz
        + (D_in * H + H * C) * w_isz
        + (H + C) * 4
    )

    # Scoped-VMEM estimate: double-buffered x/out blocks + resident weights + f32 hidden temps.
    vmem_est = (
        2 * (tile_b * D_in * x_isz + tile_b * C * o_isz
             + (D_in * H + H * C) * w_isz + (H + C) * 4)
        + 2 * tile_b * H * 4
    )
    vmem_limit = None
    if vmem_est > (12 << 20):           # only relevant for v5e's 16 MiB default when tile_b is huge
        vmem_limit = min(vmem_est + (8 << 20), 56 << 20)

    out = pl.pallas_call(
        _mlp_kernel,
        out_shape=jax.ShapeDtypeStruct((B_pad, C), out_dtype),
        grid_spec=pl.GridSpec(
            grid=(grid_b,),
            in_specs=[
                pl.BlockSpec((tile_b, D_in), lambda i: (i, 0)),   # x tile (streamed)
                pl.BlockSpec((D_in, H), lambda i: (0, 0)),        # W1 (resident, constant index_map)
                pl.BlockSpec((1, H), lambda i: (0, 0)),           # b1 (f32)
                pl.BlockSpec((H, C), lambda i: (0, 0)),           # W2 (unpadded, resident)
                pl.BlockSpec((1, C), lambda i: (0, 0)),           # b2 (f32)
            ],
            out_specs=pl.BlockSpec((tile_b, C), lambda i: (i, 0)),  # narrow (B, C) store
        ),
        compiler_params=pltpu.CompilerParams(
            dimension_semantics=("parallel",),
            vmem_limit_bytes=vmem_limit,
        ),
        cost_estimate=pl.CostEstimate(
            flops=flops, transcendentals=0, bytes_accessed=bytes_accessed),
    )(x, w1, b1, w2, b2)

    return out if B_pad == B else out[:B]


if __name__ == "__main__":
    # Shapes consistent with the module: input_dim=32, hidden_dim=256, num_classes=2.
    D_IN, HID, NCLS = 32, 256, 2

    key = jax.random.PRNGKey(0)
    k_x, k_w1, k_b1, k_w2, k_b2, k_x2, k_x3 = jax.random.split(key, 7)

    # PyTorch Linear weight is [out, in]; stored transposed here as [in, out].
    lim1 = 1.0 / jnp.sqrt(D_IN)
    w1 = jax.random.uniform(k_w1, (D_IN, HID), minval=-lim1, maxval=lim1, dtype=jnp.float32)
    b1 = jax.random.uniform(k_b1, (1, HID), minval=-lim1, maxval=lim1, dtype=jnp.float32)
    lim2 = 1.0 / jnp.sqrt(HID)
    w2 = jax.random.uniform(k_w2, (HID, NCLS), minval=-lim2, maxval=lim2, dtype=jnp.float32)
    b2 = jax.random.uniform(k_b2, (1, NCLS), minval=-lim2, maxval=lim2, dtype=jnp.float32)

    def ref(xx):
        return jnp.maximum(xx @ w1 + b1, 0.0) @ w2 + b2

    # --- Small batch (B=8), exact f32 compute path: single 8-row block, tight check. ---
    B = 8
    x = jax.random.normal(k_x, (B, D_IN), dtype=jnp.float32)
    out = jax.block_until_ready(
        feature_classifier_forward(x, w1, b1, w2, b2, compute_dtype=None))
    assert out.shape == (B, NCLS) and out.dtype == jnp.float32, (out.shape, out.dtype)
    assert jnp.allclose(out, ref(x), atol=1e-4, rtol=1e-4), "f32 small-batch mismatch vs reference"

    # --- Non-divisible batch (B=300), f32: ceil-div grid (2 even steps) + padded tail rows. ---
    B2 = 300
    x2 = jax.random.normal(k_x2, (B2, D_IN), dtype=jnp.float32)
    out2 = jax.block_until_ready(
        feature_classifier_forward(x2, w1, b1, w2, b2, compute_dtype=None))
    assert out2.shape == (B2, NCLS), out2.shape
    assert jnp.allclose(out2, ref(x2), atol=1e-4, rtol=1e-4), "f32 padded-tail mismatch vs reference"

    # --- Default bf16 compute path (f32 accumulation), loose check against the f32 reference. ---
    B3 = 256
    x3 = jax.random.normal(k_x3, (B3, D_IN), dtype=jnp.float32)
    out3 = jax.block_until_ready(feature_classifier_forward(x3, w1, b1, w2, b2))
    assert out3.shape == (B3, NCLS) and out3.dtype == jnp.float32, (out3.shape, out3.dtype)
    assert jnp.max(jnp.abs(out3 - ref(x3))) < 5e-2, "bf16 path diverged"

    print("KERNEL_OK")
</pallas_src>

<mosaic_0001>
module attributes {stable_mosaic.version = 11 : i64} {
  func.func @_mlp_kernel(%arg0: i32, %arg1: memref<8x32xf32, #tpu.memory_space<vmem>>, %arg2: memref<32x256xf32, #tpu.memory_space<vmem>>, %arg3: memref<1x256xf32, #tpu.memory_space<vmem>>, %arg4: memref<256x2xf32, #tpu.memory_space<vmem>>, %arg5: memref<1x2xf32, #tpu.memory_space<vmem>>, %arg6: memref<8x2xf32, #tpu.memory_space<vmem>>) attributes {dimension_semantics = [#tpu.dimension_semantics<parallel>], iteration_bounds = array<i64: 1>, scalar_prefetch = 0 : i64, scratch_operands = 0 : i64, tpu.core_type = #tpu.core_type<tc>, window_params = [{transform_indices = @transform_0, window_bounds = array<i64: 8, 32>}, {pipeline_mode = #tpu.pipeline_mode<synchronous>, transform_indices = @transform_1, window_bounds = array<i64: 32, 256>}, {pipeline_mode = #tpu.pipeline_mode<synchronous>, transform_indices = @transform_2, window_bounds = array<i64: 1, 256>}, {pipeline_mode = #tpu.pipeline_mode<synchronous>, transform_indices = @transform_3, window_bounds = array<i64: 256, 2>}, {pipeline_mode = #tpu.pipeline_mode<synchronous>, transform_indices = @transform_4, window_bounds = array<i64: 1, 2>}, {transform_indices = @transform_5, window_bounds = array<i64: 8, 2>}]} {
    %c0 = arith.constant 0 : index
    %c0_0 = arith.constant 0 : index
    %0 = vector.load %arg1[%c0, %c0_0] : memref<8x32xf32, #tpu.memory_space<vmem>>, vector<8x32xf32>
    %c0_1 = arith.constant 0 : index
    %c0_2 = arith.constant 0 : index
    %1 = vector.load %arg2[%c0_1, %c0_2] : memref<32x256xf32, #tpu.memory_space<vmem>>, vector<32x256xf32>
    %cst = arith.constant dense<0.000000e+00> : vector<8x256xf32>
    %2 = tpu.matmul %0, %1, %cst {dimension_numbers = #tpu.dot_dimension_numbers<[1], [0], [0], [1], [0, 0, 1, 1], [], []>} : vector<8x32xf32>, vector<32x256xf32>, vector<8x256xf32> -> vector<8x256xf32>
    %c0_3 = arith.constant 0 : index
    %c0_4 = arith.constant 0 : index
    %3 = vector.load %arg3[%c0_3, %c0_4] : memref<1x256xf32, #tpu.memory_space<vmem>>, vector<1x256xf32>
    %4 = vector.broadcast %3 : vector<1x256xf32> to vector<8x256xf32>
    %5 = arith.addf %2, %4 : vector<8x256xf32>
    %cst_5 = arith.constant 0.000000e+00 : f32
    %6 = vector.broadcast %cst_5 : f32 to vector<8x256xf32>
    %7 = arith.maximumf %5, %6 : vector<8x256xf32>
    %c0_6 = arith.constant 0 : index
    %c0_7 = arith.constant 0 : index
    %8 = vector.load %arg4[%c0_6, %c0_7] : memref<256x2xf32, #tpu.memory_space<vmem>>, vector<256x2xf32>
    %cst_8 = arith.constant dense<0.000000e+00> : vector<8x2xf32>
    %9 = tpu.matmul %7, %8, %cst_8 {dimension_numbers = #tpu.dot_dimension_numbers<[1], [0], [0], [1], [0, 0, 1, 1], [], []>} : vector<8x256xf32>, vector<256x2xf32>, vector<8x2xf32> -> vector<8x2xf32>
    %c0_9 = arith.constant 0 : index
    %c0_10 = arith.constant 0 : index
    %10 = vector.load %arg5[%c0_9, %c0_10] : memref<1x2xf32, #tpu.memory_space<vmem>>, vector<1x2xf32>
    %11 = vector.broadcast %10 : vector<1x2xf32> to vector<8x2xf32>
    %12 = arith.addf %9, %11 : vector<8x2xf32>
    %c0_11 = arith.constant 0 : index
    %c0_12 = arith.constant 0 : index
    %13 = vector.load %arg6[%c0_11, %c0_12] : memref<8x2xf32, #tpu.memory_space<vmem>>, vector<8x2xf32>
    tpu.vector_store %arg6[%c0_11, %c0_12], %12 {strides = array<i32>} : memref<8x2xf32, #tpu.memory_space<vmem>>, vector<8x2xf32>,
    return
  }
  func.func @transform_0(%arg0: i32) -> (i32, i32) {
    %c0_i32 = arith.constant 0 : i32
    %c0_i32_0 = arith.constant 0 : i32
    return %arg0, %c0_i32 : i32, i32
  }
  func.func @transform_1(%arg0: i32) -> (i32, i32) {
    %c0_i32 = arith.constant 0 : i32
    %c0_i32_0 = arith.constant 0 : i32
    %c0_i32_1 = arith.constant 0 : i32
    return %c0_i32, %c0_i32_0 : i32, i32
  }
  func.func @transform_2(%arg0: i32) -> (i32, i32) {
    %c0_i32 = arith.constant 0 : i32
    %c0_i32_0 = arith.constant 0 : i32
    %c0_i32_1 = arith.constant 0 : i32
    return %c0_i32, %c0_i32_0 : i32, i32
  }
  func.func @transform_3(%arg0: i32) -> (i32, i32) {
    %c0_i32 = arith.constant 0 : i32
    %c0_i32_0 = arith.constant 0 : i32
    %c0_i32_1 = arith.constant 0 : i32
    return %c0_i32, %c0_i32_0 : i32, i32
  }
  func.func @transform_4(%arg0: i32) -> (i32, i32) {
    %c0_i32 = arith.constant 0 : i32
    %c0_i32_0 = arith.constant 0 : i32
    %c0_i32_1 = arith.constant 0 : i32
    return %c0_i32, %c0_i32_0 : i32, i32
  }
  func.func @transform_5(%arg0: i32) -> (i32, i32) {
    %c0_i32 = arith.constant 0 : i32
    %c0_i32_0 = arith.constant 0 : i32
    return %arg0, %c0_i32 : i32, i32
  }
}

</mosaic_0001>

<bundles_post_ra>
// kernel: tpu_custom_call.1
= control target key start
LH: loop header
LB: loop body
LE: loop exit
PB: predicated region body
PF: predicated region fallthrough
CT: control target
= control target key end

     0   :  { %v311_v3 = vmov 0.0   ;;  %vm41_vm0 = vcmask 261120   ;;  %v31_v62 = vlaneseq  ;;  %vm227_vm1 = vcmask 15360   ;;  %s474_s1 = inlined_call_operand.vmem [shape: f32[32,256], index: 1, kind: input, shape index: {}]   ;;  %s475_s3 = inlined_call_operand.vmem [shape: f32[256,2], index: 3, kind: input, shape index: {}]   ;;  %s476_s0 = inlined_call_operand.vmem [shape: f32[8,32], index: 0, kind: input, shape index: {}]   ;;  %s477_s2 = inlined_call_operand.vmem [shape: f32[1,256], index: 2, kind: input, shape index: {}]   ;;  %s478_s4 = inlined_call_operand.vmem [shape: f32[1,2], index: 4, kind: input, shape index: {}]   ;;  %s479_s5 = inlined_call_operand.vmem [shape: f32[8,2], index: 5, kind: output, shape index: {}]  }
   0x1   :  { %v22_v0 = vld [vmem:[%s474_s1 + $0x8] sm:$0xff]  ;;  %v24_v1 = vld [vmem:[%s474_s1 + $0x18] sm:$0xff]  ;;  %v21_v2 = vld [vmem:[%s474_s1] sm:$0xff]  ;;  %109 = vmatprep.mubr.f32.mxu0 %v311_v3 }
   0x2   :  { %v270_v4 = vpack.c.bf16 %v24_v1, %v22_v0  ;;  %v23_v5 = vld [vmem:[%s474_s1 + $0x10] sm:$0xff]  ;;  %v26_v6 = vld [vmem:[%s474_s1 + $0x28] sm:$0xff]  ;;  %v28_v7 = vld [vmem:[%s474_s1 + $0x38] sm:$0xff]  ;;  %v32_v63 = vshrl.u32 %v31_v62, 7 }
   0x3   :  { %v272_v8 = vpack.c.bf16 %v23_v5, %v21_v2  ;;  %v274_v9 = vpack.c.bf16 %v28_v7, %v26_v6  ;;  %v25_v10 = vld [vmem:[%s474_s1 + $0x20] sm:$0xff]  ;;  %v27_v11 = vld [vmem:[%s474_s1 + $0x30] sm:$0xff]  ;;  %v135_v13 = vld [vmem:[%s475_s3 + $0x88] sm:$0xff] }
   0x4   :  { %271 = vmatprep.subr.bf16.mxu0 %v270_v4  ;;  %v134_v12 = vld [vmem:[%s475_s3 + $0x80] sm:$0xff]  ;;  %v276_v15 = vpack.c.bf16 %v27_v11, %v25_v10  ;;  %v119_v17 = vld [vmem:[%s475_s3 + $0x8] sm:$0xff]  ;;  %v136_v18 = vld [vmem:[%s475_s3 + $0x90] sm:$0xff]  ;;  %v33_v0 = vsub.s32 0, %v32_v63  ;;  %v37_v2 = vsub.s32 1, %v32_v63 }
   0x5   :  { %v118_v14 = vld [vmem:[%s475_s3] sm:$0xff]  ;;  %273 = vmatpush1.bf16.msra.mxu0 %v272_v8  ;;  %v278_v16 = vpack.c.bf16 %v135_v13, %v134_v12  ;;  %v137_v19 = vld [vmem:[%s475_s3 + $0x98] sm:$0xff]  ;;  %v120_v22 = vld [vmem:[%s475_s3 + $0x10] sm:$0xff] }
   0x6   :  { %275 = vmatprep.subr.bf16.mxu0 %v274_v9  ;;  %v280_v20 = vpack.c.bf16 %v119_v17, %v118_v14  ;;  %v282_v21 = vpack.c.bf16 %v137_v19, %v136_v18  ;;  %v121_v23 = vld [vmem:[%s475_s3 + $0x18] sm:$0xff]  ;;  %v138_v24 = vld [vmem:[%s475_s3 + $0xa0] sm:$0xff]  ;;  %v139_v25 = vld [vmem:[%s475_s3 + $0xa8] sm:$0xff] }
   0x7   :  { %279 = vmatprep.subr.bf16.mxu1 %v278_v16  ;;  %v284_v26 = vpack.c.bf16 %v121_v23, %v120_v22  ;;  %v20_v27 = vld [vmem:[%s476_s0] sm:$0xff]  ;;  %v286_v28 = vpack.c.bf16 %v139_v25, %v138_v24  ;;  %v123_v30 = vld [vmem:[%s475_s3 + $0x28] sm:$0xff]  ;;  %v140_v31 = vld [vmem:[%s475_s3 + $0xb0] sm:$0xff] }
   0x8   :  { %281 = vmatpush3.bf16.msra.mxu1 %v280_v20  ;;  %v122_v29 = vld [vmem:[%s475_s3 + $0x20] sm:$0xff]  ;;  %v141_v32 = vld [vmem:[%s475_s3 + $0xb8] sm:$0xff]  ;;  %v124_v35 = vld [vmem:[%s475_s3 + $0x30] sm:$0xff] }
   0x9   :  { %277 = vmatpush1.bf16.msra.mxu0 %v276_v15  ;;  %283 = vmatprep.subr.bf16.mxu1 %v282_v21  ;;  %v288_v33 = vpack.c.bf16 %v123_v30, %v122_v29  ;;  %v290_v34 = vpack.c.bf16 %v141_v32, %v140_v31  ;;  %v125_v36 = vld [vmem:[%s475_s3 + $0x38] sm:$0xff]  ;;  %v142_v37 = vld [vmem:[%s475_s3 + $0xc0] sm:$0xff]  ;;  %v143_v38 = vld [vmem:[%s475_s3 + $0xc8] sm:$0xff] }
   0xa   :  { %v292_v39 = vpack.c.bf16 %v125_v36, %v124_v35  ;;  %v294_v40 = vpack.c.bf16 %v143_v38, %v142_v37  ;;  %v126_v41 = vld [vmem:[%s475_s3 + $0x40] sm:$0xff]  ;;  %v127_v42 = vld [vmem:[%s475_s3 + $0x48] sm:$0xff]  ;;  %v144_v43 = vld [vmem:[%s475_s3 + $0xd0] sm:$0xff] }
   0xb   :  { %v145_v44 = vld [vmem:[%s475_s3 + $0xd8] sm:$0xff]  ;;  %v296_v45 = vpack.c.bf16 %v127_v42, %v126_v41  ;;  %v128_v47 = vld [vmem:[%s475_s3 + $0x50] sm:$0xff]  ;;  %v146_v49 = vld [vmem:[%s475_s3 + $0xe0] sm:$0xff] }
   0xc   :  { %233 = vmatmul.mubr.msk.f32.vlgmr.msra.gmra.mrb[0].mxu0 %vm41_vm0, %v20_v27  ;;  %285 = vmatpush3.bf16.msra.mxu1 %v284_v26  ;;  %v298_v46 = vpack.c.bf16 %v145_v44, %v144_v43  ;;  %v129_v48 = vld [vmem:[%s475_s3 + $0x58] sm:$0xff]  ;;  %v147_v50 = vld [vmem:[%s475_s3 + $0xe8] sm:$0xff]  ;;  %v130_v53 = vld [vmem:[%s475_s3 + $0x60] sm:$0xff] }
   0xd   :  { %287 = vmatprep.subr.bf16.mxu1 %v286_v28  ;;  %v300_v51 = vpack.c.bf16 %v129_v48, %v128_v47  ;;  %v302_v52 = vpack.c.bf16 %v147_v50, %v146_v49  ;;  %v131_v54 = vld [vmem:[%s475_s3 + $0x68] sm:$0xff]  ;;  %v148_v56 = vld [vmem:[%s475_s3 + $0xf0] sm:$0xff]  ;;  %v149_v57 = vld [vmem:[%s475_s3 + $0xf8] sm:$0xff] }
   0xe   :  { %v304_v55 = vpack.c.bf16 %v131_v54, %v130_v53  ;;  %v306_v58 = vpack.c.bf16 %v149_v57, %v148_v56  ;;  %v132_v59 = vld [vmem:[%s475_s3 + $0x70] sm:$0xff]  ;;  %v133_v60 = vld [vmem:[%s475_s3 + $0x78] sm:$0xff]  ;;  %v29_v1 = vld [vmem:[%s477_s2] sm:$0x3] }
   0xf   :  { %v308_v61 = vpack.c.bf16 %v133_v60, %v132_v59  ;;  %v34_v3 = vrot.slane %v29_v1, %v33_v0  ;;  %v38_v4 = vrot.slane %v29_v1, %v37_v2  ;;  %v234_v12 = vld [vmem:[%s478_s4] ss:$0 sm:$0xff] }
  0x10   :  { %289 = vmatpush3.bf16.msra.mxu1 %v288_v33 }
  0x11   :  { %291 = vmatprep.subr.bf16.mxu1 %v290_v34 }
  0x14   :  { %293 = vmatpush3.bf16.msra.mxu1 %v292_v39 }
  0x15   :  { %295 = vmatprep.subr.bf16.mxu1 %v294_v40 }
  0x18   :  { %297 = vmatpush3.bf16.msra.mxu1 %v296_v45 }
  0x19   :  { %299 = vmatprep.subr.bf16.mxu1 %v298_v46 }
  0x1c   :  { %301 = vmatpush3.bf16.msra.mxu1 %v300_v51 }
  0x1d   :  { %303 = vmatprep.subr.bf16.mxu1 %v302_v52 }
  0x20   :  { %305 = vmatpush3.bf16.msra.mxu1 %v304_v55 }
  0x21   :  { %307 = vmatprep.subr.bf16.mxu1 %v306_v58 }
  0x24   :  { %309 = vmatpush3.bf16.msra.mxu1 %v308_v61 }
  0xdf   :  { %v111_v5 = vpop.f32.mrb[0].mxu0 }
  0xe0   :  { %v112_v6 = vadd.f32 %v111_v5, %v34_v3  ;;  %v113_v7 = vpop.f32.mrb[1].mxu0 }
  0xe1   :  { %v114_v8 = vadd.f32 %v113_v7, %v38_v4 }
  0xe2   :  { %v116_v10 = vmax.f32 %v112_v6, 0.0 }
  0xe3   :  { %v117_v9 = vmax.f32 %v114_v8, 0.0 }
  0xe5   :  { %221 = vmatprep.mubr.f32.mxu1 %v117_v9 }
  0xe6   :  { %222 = vmatmul.mubr.f32.vlgmr.msra.gmra.mrb[0].mxu1 %v116_v10 }
 0x1b9   :  { %v267_v11 = vpop.f32.mrb[0].mxu1 }
 0x1ba   :  { %v268_v13 = vpop.f32.mrb[1].mxu1 }
 0x1bb   :  { %v269_v14 = vadd.f32 %v268_v13, %v267_v11 }
 0x1bd   :  { %v224_v15 = vadd.f32 %v269_v14, %v234_v12 }
 0x1bf   :  { %228 = vst.msk [vmem:[%s479_s5] sm:$0xff] %vm227_vm1, %v224_v15 }

</bundles_post_ra>
